<compile_context>
chip_gen: v6e
topology: v6e:2x2x1
jax: 0.10.0
libtpu: 0.0.40
codegen_flags: <defaults>
</compile_context>

<pallas_src>
import jax
import jax.numpy as jnp
from jax.experimental import pallas as pl
from jax.experimental.pallas import tpu as pltpu

# ----------------------------- config ---------------------------------------
T, B, I, H = 8, 2, 16, 32          # seq, batch, input_size, hidden_size
BP = 8                             # batch padded to one full sublane group
FC1_OUT, FC2_OUT = 16, 1           # _add_fc_layers([H, 16, 1])


# ----------------------------- fused kernel ---------------------------------
def fused_rnn_kernel(x_ref, wih_ref, whh_ref, b_ref,
                     w1_ref, b1_ref, w2_ref, b2_ref,
                     o_ref, h_seq_scr):
    # ---- hoisted input projection: one (T*BP, I) @ (I, 4H) matmul + bias ----
    x_proj = (jnp.dot(x_ref[...], wih_ref[...],
                      preferred_element_type=jnp.float32)
              + b_ref[...])                                    # (T*BP, 4H)

    whh = whh_ref[...]                                         # (H, 4H)

    # ---- recurrence: fully unrolled, one MXU matmul per step ----------------
    # Gate columns arrive pre-packed as [i | f | o | g] (see wrapper), so the
    # three sigmoid gates are lane-contiguous.
    h = jnp.zeros((BP, H), jnp.float32)
    c = jnp.zeros((BP, H), jnp.float32)
    for t in range(T):
        gates = x_proj[t * BP:(t + 1) * BP, :] + jnp.dot(
            h, whh, preferred_element_type=jnp.float32)        # (BP, 4H)
        sig = jax.nn.sigmoid(gates[:, 0:3 * H])                # i|f|o, one EUP pass
        i_g = sig[:, 0 * H:1 * H]
        f_g = sig[:, 1 * H:2 * H]
        o_g = sig[:, 2 * H:3 * H]
        g_g = jnp.tanh(gates[:, 3 * H:4 * H])                  # g, one EUP pass
        c = f_g * c + i_g * g_g
        h = o_g * jnp.tanh(c)
        h_seq_scr[t * BP:(t + 1) * BP, :] = h                  # stays in VMEM

    # ---- FC head on the dense (T*BP, H) slab; dropout = identity (eval) -----
    h_all = h_seq_scr[...]                                     # (T*BP, H)
    h1 = (jnp.dot(h_all, w1_ref[...],
                  preferred_element_type=jnp.float32)
          + b1_ref[...])                                       # (T*BP, FC1)
    # Linear(16 -> 1) as elementwise mul + lane reduction (avoids N=1 matmul).
    h2 = jnp.sum(h1 * w2_ref[...], axis=1, keepdims=True) + b2_ref[...]
    o_ref[...] = jax.nn.sigmoid(h2)                            # (T*BP, 1)


def _reorder_gate_cols(a):
    """PyTorch LSTM packs gate columns as [i, f, g, o]; regroup to [i, f, o, g]
    so the three sigmoid gates are lane-contiguous inside the kernel."""
    i, f, g, o = jnp.split(a, 4, axis=-1)
    return jnp.concatenate([i, f, o, g], axis=-1)


@jax.jit
def base_rnn_forward(x, params):
    """Full BaseRNN forward (eval mode, mode='binary'): (T,B,I) -> (T,B,1)."""
    # pad batch to BP sublanes; pad rows evolve independently and are discarded
    x_pad = jnp.zeros((T, BP, I), jnp.float32).at[:, :B, :].set(x)
    x_flat = x_pad.reshape(T * BP, I)

    wih = _reorder_gate_cols(params["w_ih_t"])                 # (I, 4H)
    whh = _reorder_gate_cols(params["w_hh_t"])                 # (H, 4H)
    b = _reorder_gate_cols(params["b_lstm"])                   # (1, 4H)

    out = pl.pallas_call(
        fused_rnn_kernel,
        out_shape=jax.ShapeDtypeStruct((T * BP, FC2_OUT), jnp.float32),
        grid_spec=pltpu.PrefetchScalarGridSpec(
            num_scalar_prefetch=0,
            grid=(1,),
            in_specs=[
                pl.BlockSpec((T * BP, I), lambda i: (0, 0)),
                pl.BlockSpec((I, 4 * H), lambda i: (0, 0)),
                pl.BlockSpec((H, 4 * H), lambda i: (0, 0)),
                pl.BlockSpec((1, 4 * H), lambda i: (0, 0)),
                pl.BlockSpec((H, FC1_OUT), lambda i: (0, 0)),
                pl.BlockSpec((1, FC1_OUT), lambda i: (0, 0)),
                pl.BlockSpec((1, FC1_OUT), lambda i: (0, 0)),
                pl.BlockSpec((1, FC2_OUT), lambda i: (0, 0)),
            ],
            out_specs=pl.BlockSpec((T * BP, FC2_OUT), lambda i: (0, 0)),
            scratch_shapes=[pltpu.VMEM((T * BP, H), jnp.float32)],
        ),
        compiler_params=pltpu.CompilerParams(
            dimension_semantics=("arbitrary",)),
    )(x_flat, wih, whh, b,
      params["w1_t"], params["b1"], params["w2_row"], params["b2"])

    return out.reshape(T, BP, FC2_OUT)[:, :B, :]


# ----------------------------- pure-JAX reference ----------------------------
def reference_forward(x, params):
    w_ih_t, w_hh_t, b = params["w_ih_t"], params["w_hh_t"], params["b_lstm"]

    def step(carry, x_t):
        h, c = carry
        gates = x_t @ w_ih_t + h @ w_hh_t + b
        i_g = jax.nn.sigmoid(gates[:, 0 * H:1 * H])
        f_g = jax.nn.sigmoid(gates[:, 1 * H:2 * H])
        g_g = jnp.tanh(gates[:, 2 * H:3 * H])
        o_g = jax.nn.sigmoid(gates[:, 3 * H:4 * H])
        c_new = f_g * c + i_g * g_g
        h_new = o_g * jnp.tanh(c_new)
        return (h_new, c_new), h_new

    init = (jnp.zeros((B, H), jnp.float32), jnp.zeros((B, H), jnp.float32))
    _, h_seq = jax.lax.scan(step, init, x)
    flat = h_seq.reshape(T * B, H)
    h1 = flat @ params["w1_t"] + params["b1"]
    h2 = h1 @ params["w2_row"].T + params["b2"]
    return jax.nn.sigmoid(h2).reshape(T, B, FC2_OUT)


# ----------------------------- param init -----------------------------------
def init_params(key):
    ks = jax.random.split(key, 8)
    s = 1.0 / jnp.sqrt(H)  # PyTorch-style uniform(-1/sqrt(H), 1/sqrt(H))
    u = lambda k, shape, sc: jax.random.uniform(k, shape, jnp.float32, -sc, sc)
    w_ih = u(ks[0], (4 * H, I), s)      # PyTorch weight_ih_l0 layout (4H, I)
    w_hh = u(ks[1], (4 * H, H), s)
    b_ih = u(ks[2], (4 * H,), s)
    b_hh = u(ks[3], (4 * H,), s)
    w1 = u(ks[4], (FC1_OUT, H), 1.0 / jnp.sqrt(H))
    b1 = u(ks[5], (FC1_OUT,), 1.0 / jnp.sqrt(H))
    w2 = u(ks[6], (FC2_OUT, FC1_OUT), 1.0 / jnp.sqrt(FC1_OUT))
    b2 = u(ks[7], (FC2_OUT,), 1.0 / jnp.sqrt(FC1_OUT))
    return {
        "w_ih_t": w_ih.T,                              # (I, 4H), gate order i,f,g,o
        "w_hh_t": w_hh.T,                              # (H, 4H)
        "b_lstm": (b_ih + b_hh).reshape(1, 4 * H),     # (1, 4H)
        "w1_t": w1.T,                                  # (H, FC1)
        "b1": b1.reshape(1, FC1_OUT),
        "w2_row": w2,                                  # (1, FC1) row vector
        "b2": b2.reshape(1, FC2_OUT),
    }


if __name__ == "__main__":
    key = jax.random.PRNGKey(0)
    k_x, k_p = jax.random.split(key)
    x = jax.random.normal(k_x, (T, B, I), jnp.float32)   # (seq, batch, input) like nn.LSTM
    params = init_params(k_p)

    out = base_rnn_forward(x, params)
    out = jax.block_until_ready(out)

    ref = reference_forward(x, params)
    assert out.shape == (T, B, 1)
    assert jnp.allclose(out, ref, atol=1e-5, rtol=1e-5), "mismatch vs JAX reference"
    print("KERNEL_OK")
</pallas_src>

<mosaic_0001>
module attributes {stable_mosaic.version = 11 : i64} {
  func.func @fused_rnn_kernel(%arg0: i32, %arg1: memref<64x16xf32, #tpu.memory_space<vmem>>, %arg2: memref<16x128xf32, #tpu.memory_space<vmem>>, %arg3: memref<32x128xf32, #tpu.memory_space<vmem>>, %arg4: memref<1x128xf32, #tpu.memory_space<vmem>>, %arg5: memref<32x16xf32, #tpu.memory_space<vmem>>, %arg6: memref<1x16xf32, #tpu.memory_space<vmem>>, %arg7: memref<1x16xf32, #tpu.memory_space<vmem>>, %arg8: memref<1x1xf32, #tpu.memory_space<vmem>>, %arg9: memref<64x1xf32, #tpu.memory_space<vmem>>, %arg10: memref<64x32xf32, #tpu.memory_space<vmem>>) attributes {dimension_semantics = [#tpu.dimension_semantics<arbitrary>], iteration_bounds = array<i64: 1>, scalar_prefetch = 0 : i64, scratch_operands = 1 : i64, tpu.core_type = #tpu.core_type<tc>, window_params = [{pipeline_mode = #tpu.pipeline_mode<synchronous>, transform_indices = @transform_0, window_bounds = array<i64: 64, 16>}, {pipeline_mode = #tpu.pipeline_mode<synchronous>, transform_indices = @transform_1, window_bounds = array<i64: 16, 128>}, {pipeline_mode = #tpu.pipeline_mode<synchronous>, transform_indices = @transform_2, window_bounds = array<i64: 32, 128>}, {pipeline_mode = #tpu.pipeline_mode<synchronous>, transform_indices = @transform_3, window_bounds = array<i64: 1, 128>}, {pipeline_mode = #tpu.pipeline_mode<synchronous>, transform_indices = @transform_4, window_bounds = array<i64: 32, 16>}, {pipeline_mode = #tpu.pipeline_mode<synchronous>, transform_indices = @transform_5, window_bounds = array<i64: 1, 16>}, {pipeline_mode = #tpu.pipeline_mode<synchronous>, transform_indices = @transform_6, window_bounds = array<i64: 1, 16>}, {pipeline_mode = #tpu.pipeline_mode<synchronous>, transform_indices = @transform_7, window_bounds = array<i64: 1, 1>}, {pipeline_mode = #tpu.pipeline_mode<synchronous>, transform_indices = @transform_8, window_bounds = array<i64: 64, 1>}]} {
    %c0 = arith.constant 0 : index
    %c0_0 = arith.constant 0 : index
    %0 = vector.load %arg1[%c0, %c0_0] : memref<64x16xf32, #tpu.memory_space<vmem>>, vector<64x16xf32>
    %c0_1 = arith.constant 0 : index
    %c0_2 = arith.constant 0 : index
    %1 = vector.load %arg2[%c0_1, %c0_2] : memref<16x128xf32, #tpu.memory_space<vmem>>, vector<16x128xf32>
    %cst = arith.constant dense<0.000000e+00> : vector<64x128xf32>
    %2 = tpu.matmul %0, %1, %cst {dimension_numbers = #tpu.dot_dimension_numbers<[1], [0], [0], [1], [0, 0, 1, 1], [], []>} : vector<64x16xf32>, vector<16x128xf32>, vector<64x128xf32> -> vector<64x128xf32>
    %c0_3 = arith.constant 0 : index
    %c0_4 = arith.constant 0 : index
    %3 = vector.load %arg4[%c0_3, %c0_4] : memref<1x128xf32, #tpu.memory_space<vmem>>, vector<1x128xf32>
    %4 = vector.broadcast %3 : vector<1x128xf32> to vector<64x128xf32>
    %5 = arith.addf %2, %4 : vector<64x128xf32>
    %c0_5 = arith.constant 0 : index
    %c0_6 = arith.constant 0 : index
    %6 = vector.load %arg3[%c0_5, %c0_6] : memref<32x128xf32, #tpu.memory_space<vmem>>, vector<32x128xf32>
    %cst_7 = arith.constant 0.000000e+00 : f32
    %7 = vector.broadcast %cst_7 : f32 to vector<8x32xf32>
    %cst_8 = arith.constant 0.000000e+00 : f32
    %8 = vector.broadcast %cst_8 : f32 to vector<8x32xf32>
    %9 = vector.extract_strided_slice %5 {offsets = [0, 0], sizes = [8, 128], strides = [1, 1]} : vector<64x128xf32> to vector<8x128xf32>
    %cst_9 = arith.constant dense<0.000000e+00> : vector<8x128xf32>
    %10 = tpu.matmul %7, %6, %cst_9 {dimension_numbers = #tpu.dot_dimension_numbers<[1], [0], [0], [1], [0, 0, 1, 1], [], []>} : vector<8x32xf32>, vector<32x128xf32>, vector<8x128xf32> -> vector<8x128xf32>
    %11 = arith.addf %9, %10 : vector<8x128xf32>
    %12 = vector.extract_strided_slice %11 {offsets = [0, 0], sizes = [8, 96], strides = [1, 1]} : vector<8x128xf32> to vector<8x96xf32>
    %13 = arith.negf %12 : vector<8x96xf32>
    %14 = math.exp %13 : vector<8x96xf32>
    %cst_10 = arith.constant 1.000000e+00 : f32
    %15 = vector.broadcast %cst_10 : f32 to vector<8x96xf32>
    %16 = arith.addf %15, %14 : vector<8x96xf32>
    %17 = arith.divf %15, %16 : vector<8x96xf32>
    %18 = vector.extract_strided_slice %17 {offsets = [0, 0], sizes = [8, 32], strides = [1, 1]} : vector<8x96xf32> to vector<8x32xf32>
    %19 = vector.extract_strided_slice %17 {offsets = [0, 32], sizes = [8, 32], strides = [1, 1]} : vector<8x96xf32> to vector<8x32xf32>
    %20 = vector.extract_strided_slice %17 {offsets = [0, 64], sizes = [8, 32], strides = [1, 1]} : vector<8x96xf32> to vector<8x32xf32>
    %21 = vector.extract_strided_slice %11 {offsets = [0, 96], sizes = [8, 32], strides = [1, 1]} : vector<8x128xf32> to vector<8x32xf32>
    %22 = math.tanh %21 : vector<8x32xf32>
    %23 = arith.mulf %19, %8 : vector<8x32xf32>
    %24 = arith.mulf %18, %22 : vector<8x32xf32>
    %25 = arith.addf %23, %24 : vector<8x32xf32>
    %26 = math.tanh %25 : vector<8x32xf32>
    %27 = arith.mulf %20, %26 : vector<8x32xf32>
    %c0_11 = arith.constant 0 : index
    %c0_12 = arith.constant 0 : index
    %28 = vector.load %arg10[%c0_11, %c0_12] : memref<64x32xf32, #tpu.memory_space<vmem>>, vector<8x32xf32>
    tpu.vector_store %arg10[%c0_11, %c0_12], %27 {strides = array<i32>} : memref<64x32xf32, #tpu.memory_space<vmem>>, vector<8x32xf32>,
    %29 = vector.extract_strided_slice %5 {offsets = [8, 0], sizes = [8, 128], strides = [1, 1]} : vector<64x128xf32> to vector<8x128xf32>
    %cst_13 = arith.constant dense<0.000000e+00> : vector<8x128xf32>
    %30 = tpu.matmul %27, %6, %cst_13 {dimension_numbers = #tpu.dot_dimension_numbers<[1], [0], [0], [1], [0, 0, 1, 1], [], []>} : vector<8x32xf32>, vector<32x128xf32>, vector<8x128xf32> -> vector<8x128xf32>
    %31 = arith.addf %29, %30 : vector<8x128xf32>
    %32 = vector.extract_strided_slice %31 {offsets = [0, 0], sizes = [8, 96], strides = [1, 1]} : vector<8x128xf32> to vector<8x96xf32>
    %33 = arith.negf %32 : vector<8x96xf32>
    %34 = math.exp %33 : vector<8x96xf32>
    %cst_14 = arith.constant 1.000000e+00 : f32
    %35 = vector.broadcast %cst_14 : f32 to vector<8x96xf32>
    %36 = arith.addf %35, %34 : vector<8x96xf32>
    %37 = arith.divf %35, %36 : vector<8x96xf32>
    %38 = vector.extract_strided_slice %37 {offsets = [0, 0], sizes = [8, 32], strides = [1, 1]} : vector<8x96xf32> to vector<8x32xf32>
    %39 = vector.extract_strided_slice %37 {offsets = [0, 32], sizes = [8, 32], strides = [1, 1]} : vector<8x96xf32> to vector<8x32xf32>
    %40 = vector.extract_strided_slice %37 {offsets = [0, 64], sizes = [8, 32], strides = [1, 1]} : vector<8x96xf32> to vector<8x32xf32>
    %41 = vector.extract_strided_slice %31 {offsets = [0, 96], sizes = [8, 32], strides = [1, 1]} : vector<8x128xf32> to vector<8x32xf32>
    %42 = math.tanh %41 : vector<8x32xf32>
    %43 = arith.mulf %39, %25 : vector<8x32xf32>
    %44 = arith.mulf %38, %42 : vector<8x32xf32>
    %45 = arith.addf %43, %44 : vector<8x32xf32>
    %46 = math.tanh %45 : vector<8x32xf32>
    %47 = arith.mulf %40, %46 : vector<8x32xf32>
    %c8 = arith.constant 8 : index
    %c0_15 = arith.constant 0 : index
    %48 = vector.load %arg10[%c8, %c0_15] : memref<64x32xf32, #tpu.memory_space<vmem>>, vector<8x32xf32>
    tpu.vector_store %arg10[%c8, %c0_15], %47 {strides = array<i32>} : memref<64x32xf32, #tpu.memory_space<vmem>>, vector<8x32xf32>,
    %49 = vector.extract_strided_slice %5 {offsets = [16, 0], sizes = [8, 128], strides = [1, 1]} : vector<64x128xf32> to vector<8x128xf32>
    %cst_16 = arith.constant dense<0.000000e+00> : vector<8x128xf32>
    %50 = tpu.matmul %47, %6, %cst_16 {dimension_numbers = #tpu.dot_dimension_numbers<[1], [0], [0], [1], [0, 0, 1, 1], [], []>} : vector<8x32xf32>, vector<32x128xf32>, vector<8x128xf32> -> vector<8x128xf32>
    %51 = arith.addf %49, %50 : vector<8x128xf32>
    %52 = vector.extract_strided_slice %51 {offsets = [0, 0], sizes = [8, 96], strides = [1, 1]} : vector<8x128xf32> to vector<8x96xf32>
    %53 = arith.negf %52 : vector<8x96xf32>
    %54 = math.exp %53 : vector<8x96xf32>
    %cst_17 = arith.constant 1.000000e+00 : f32
    %55 = vector.broadcast %cst_17 : f32 to vector<8x96xf32>
    %56 = arith.addf %55, %54 : vector<8x96xf32>
    %57 = arith.divf %55, %56 : vector<8x96xf32>
    %58 = vector.extract_strided_slice %57 {offsets = [0, 0], sizes = [8, 32], strides = [1, 1]} : vector<8x96xf32> to vector<8x32xf32>
    %59 = vector.extract_strided_slice %57 {offsets = [0, 32], sizes = [8, 32], strides = [1, 1]} : vector<8x96xf32> to vector<8x32xf32>
    %60 = vector.extract_strided_slice %57 {offsets = [0, 64], sizes = [8, 32], strides = [1, 1]} : vector<8x96xf32> to vector<8x32xf32>
    %61 = vector.extract_strided_slice %51 {offsets = [0, 96], sizes = [8, 32], strides = [1, 1]} : vector<8x128xf32> to vector<8x32xf32>
    %62 = math.tanh %61 : vector<8x32xf32>
    %63 = arith.mulf %59, %45 : vector<8x32xf32>
    %64 = arith.mulf %58, %62 : vector<8x32xf32>
    %65 = arith.addf %63, %64 : vector<8x32xf32>
    %66 = math.tanh %65 : vector<8x32xf32>
    %67 = arith.mulf %60, %66 : vector<8x32xf32>
    %c16 = arith.constant 16 : index
    %c0_18 = arith.constant 0 : index
    %68 = vector.load %arg10[%c16, %c0_18] : memref<64x32xf32, #tpu.memory_space<vmem>>, vector<8x32xf32>
    tpu.vector_store %arg10[%c16, %c0_18], %67 {strides = array<i32>} : memref<64x32xf32, #tpu.memory_space<vmem>>, vector<8x32xf32>,
    %69 = vector.extract_strided_slice %5 {offsets = [24, 0], sizes = [8, 128], strides = [1, 1]} : vector<64x128xf32> to vector<8x128xf32>
    %cst_19 = arith.constant dense<0.000000e+00> : vector<8x128xf32>
    %70 = tpu.matmul %67, %6, %cst_19 {dimension_numbers = #tpu.dot_dimension_numbers<[1], [0], [0], [1], [0, 0, 1, 1], [], []>} : vector<8x32xf32>, vector<32x128xf32>, vector<8x128xf32> -> vector<8x128xf32>
    %71 = arith.addf %69, %70 : vector<8x128xf32>
    %72 = vector.extract_strided_slice %71 {offsets = [0, 0], sizes = [8, 96], strides = [1, 1]} : vector<8x128xf32> to vector<8x96xf32>
    %73 = arith.negf %72 : vector<8x96xf32>
    %74 = math.exp %73 : vector<8x96xf32>
    %cst_20 = arith.constant 1.000000e+00 : f32
    %75 = vector.broadcast %cst_20 : f32 to vector<8x96xf32>
    %76 = arith.addf %75, %74 : vector<8x96xf32>
    %77 = arith.divf %75, %76 : vector<8x96xf32>
    %78 = vector.extract_strided_slice %77 {offsets = [0, 0], sizes = [8, 32], strides = [1, 1]} : vector<8x96xf32> to vector<8x32xf32>
    %79 = vector.extract_strided_slice %77 {offsets = [0, 32], sizes = [8, 32], strides = [1, 1]} : vector<8x96xf32> to vector<8x32xf32>
    %80 = vector.extract_strided_slice %77 {offsets = [0, 64], sizes = [8, 32], strides = [1, 1]} : vector<8x96xf32> to vector<8x32xf32>
    %81 = vector.extract_strided_slice %71 {offsets = [0, 96], sizes = [8, 32], strides = [1, 1]} : vector<8x128xf32> to vector<8x32xf32>
    %82 = math.tanh %81 : vector<8x32xf32>
    %83 = arith.mulf %79, %65 : vector<8x32xf32>
    %84 = arith.mulf %78, %82 : vector<8x32xf32>
    %85 = arith.addf %83, %84 : vector<8x32xf32>
    %86 = math.tanh %85 : vector<8x32xf32>
    %87 = arith.mulf %80, %86 : vector<8x32xf32>
    %c24 = arith.constant 24 : index
    %c0_21 = arith.constant 0 : index
    %88 = vector.load %arg10[%c24, %c0_21] : memref<64x32xf32, #tpu.memory_space<vmem>>, vector<8x32xf32>
    tpu.vector_store %arg10[%c24, %c0_21], %87 {strides = array<i32>} : memref<64x32xf32, #tpu.memory_space<vmem>>, vector<8x32xf32>,
    %89 = vector.extract_strided_slice %5 {offsets = [32, 0], sizes = [8, 128], strides = [1, 1]} : vector<64x128xf32> to vector<8x128xf32>
    %cst_22 = arith.constant dense<0.000000e+00> : vector<8x128xf32>
    %90 = tpu.matmul %87, %6, %cst_22 {dimension_numbers = #tpu.dot_dimension_numbers<[1], [0], [0], [1], [0, 0, 1, 1], [], []>} : vector<8x32xf32>, vector<32x128xf32>, vector<8x128xf32> -> vector<8x128xf32>
    %91 = arith.addf %89, %90 : vector<8x128xf32>
    %92 = vector.extract_strided_slice %91 {offsets = [0, 0], sizes = [8, 96], strides = [1, 1]} : vector<8x128xf32> to vector<8x96xf32>
    %93 = arith.negf %92 : vector<8x96xf32>
    %94 = math.exp %93 : vector<8x96xf32>
    %cst_23 = arith.constant 1.000000e+00 : f32
    %95 = vector.broadcast %cst_23 : f32 to vector<8x96xf32>
    %96 = arith.addf %95, %94 : vector<8x96xf32>
    %97 = arith.divf %95, %96 : vector<8x96xf32>
    %98 = vector.extract_strided_slice %97 {offsets = [0, 0], sizes = [8, 32], strides = [1, 1]} : vector<8x96xf32> to vector<8x32xf32>
    %99 = vector.extract_strided_slice %97 {offsets = [0, 32], sizes = [8, 32], strides = [1, 1]} : vector<8x96xf32> to vector<8x32xf32>
    %100 = vector.extract_strided_slice %97 {offsets = [0, 64], sizes = [8, 32], strides = [1, 1]} : vector<8x96xf32> to vector<8x32xf32>
    %101 = vector.extract_strided_slice %91 {offsets = [0, 96], sizes = [8, 32], strides = [1, 1]} : vector<8x128xf32> to vector<8x32xf32>
    %102 = math.tanh %101 : vector<8x32xf32>
    %103 = arith.mulf %99, %85 : vector<8x32xf32>
    %104 = arith.mulf %98, %102 : vector<8x32xf32>
    %105 = arith.addf %103, %104 : vector<8x32xf32>
    %106 = math.tanh %105 : vector<8x32xf32>
    %107 = arith.mulf %100, %106 : vector<8x32xf32>
    %c32 = arith.constant 32 : index
    %c0_24 = arith.constant 0 : index
    %108 = vector.load %arg10[%c32, %c0_24] : memref<64x32xf32, #tpu.memory_space<vmem>>, vector<8x32xf32>
    tpu.vector_store %arg10[%c32, %c0_24], %107 {strides = array<i32>} : memref<64x32xf32, #tpu.memory_space<vmem>>, vector<8x32xf32>,
    %109 = vector.extract_strided_slice %5 {offsets = [40, 0], sizes = [8, 128], strides = [1, 1]} : vector<64x128xf32> to vector<8x128xf32>
    %cst_25 = arith.constant dense<0.000000e+00> : vector<8x128xf32>
    %110 = tpu.matmul %107, %6, %cst_25 {dimension_numbers = #tpu.dot_dimension_numbers<[1], [0], [0], [1], [0, 0, 1, 1], [], []>} : vector<8x32xf32>, vector<32x128xf32>, vector<8x128xf32> -> vector<8x128xf32>
    %111 = arith.addf %109, %110 : vector<8x128xf32>
    %112 = vector.extract_strided_slice %111 {offsets = [0, 0], sizes = [8, 96], strides = [1, 1]} : vector<8x128xf32> to vector<8x96xf32>
    %113 = arith.negf %112 : vector<8x96xf32>
    %114 = math.exp %113 : vector<8x96xf32>
    %cst_26 = arith.constant 1.000000e+00 : f32
    %115 = vector.broadcast %cst_26 : f32 to vector<8x96xf32>
    %116 = arith.addf %115, %114 : vector<8x96xf32>
    %117 = arith.divf %115, %116 : vector<8x96xf32>
    %118 = vector.extract_strided_slice %117 {offsets = [0, 0], sizes = [8, 32], strides = [1, 1]} : vector<8x96xf32> to vector<8x32xf32>
    %119 = vector.extract_strided_slice %117 {offsets = [0, 32], sizes = [8, 32], strides = [1, 1]} : vector<8x96xf32> to vector<8x32xf32>
    %120 = vector.extract_strided_slice %117 {offsets = [0, 64], sizes = [8, 32], strides = [1, 1]} : vector<8x96xf32> to vector<8x32xf32>
    %121 = vector.extract_strided_slice %111 {offsets = [0, 96], sizes = [8, 32], strides = [1, 1]} : vector<8x128xf32> to vector<8x32xf32>
    %122 = math.tanh %121 : vector<8x32xf32>
    %123 = arith.mulf %119, %105 : vector<8x32xf32>
    %124 = arith.mulf %118, %122 : vector<8x32xf32>
    %125 = arith.addf %123, %124 : vector<8x32xf32>
    %126 = math.tanh %125 : vector<8x32xf32>
    %127 = arith.mulf %120, %126 : vector<8x32xf32>
    %c40 = arith.constant 40 : index
    %c0_27 = arith.constant 0 : index
    %128 = vector.load %arg10[%c40, %c0_27] : memref<64x32xf32, #tpu.memory_space<vmem>>, vector<8x32xf32>
    tpu.vector_store %arg10[%c40, %c0_27], %127 {strides = array<i32>} : memref<64x32xf32, #tpu.memory_space<vmem>>, vector<8x32xf32>,
    %129 = vector.extract_strided_slice %5 {offsets = [48, 0], sizes = [8, 128], strides = [1, 1]} : vector<64x128xf32> to vector<8x128xf32>
    %cst_28 = arith.constant dense<0.000000e+00> : vector<8x128xf32>
    %130 = tpu.matmul %127, %6, %cst_28 {dimension_numbers = #tpu.dot_dimension_numbers<[1], [0], [0], [1], [0, 0, 1, 1], [], []>} : vector<8x32xf32>, vector<32x128xf32>, vector<8x128xf32> -> vector<8x128xf32>
    %131 = arith.addf %129, %130 : vector<8x128xf32>
    %132 = vector.extract_strided_slice %131 {offsets = [0, 0], sizes = [8, 96], strides = [1, 1]} : vector<8x128xf32> to vector<8x96xf32>
    %133 = arith.negf %132 : vector<8x96xf32>
    %134 = math.exp %133 : vector<8x96xf32>
    %cst_29 = arith.constant 1.000000e+00 : f32
    %135 = vector.broadcast %cst_29 : f32 to vector<8x96xf32>
    %136 = arith.addf %135, %134 : vector<8x96xf32>
    %137 = arith.divf %135, %136 : vector<8x96xf32>
    %138 = vector.extract_strided_slice %137 {offsets = [0, 0], sizes = [8, 32], strides = [1, 1]} : vector<8x96xf32> to vector<8x32xf32>
    %139 = vector.extract_strided_slice %137 {offsets = [0, 32], sizes = [8, 32], strides = [1, 1]} : vector<8x96xf32> to vector<8x32xf32>
    %140 = vector.extract_strided_slice %137 {offsets = [0, 64], sizes = [8, 32], strides = [1, 1]} : vector<8x96xf32> to vector<8x32xf32>
    %141 = vector.extract_strided_slice %131 {offsets = [0, 96], sizes = [8, 32], strides = [1, 1]} : vector<8x128xf32> to vector<8x32xf32>
    %142 = math.tanh %141 : vector<8x32xf32>
    %143 = arith.mulf %139, %125 : vector<8x32xf32>
    %144 = arith.mulf %138, %142 : vector<8x32xf32>
    %145 = arith.addf %143, %144 : vector<8x32xf32>
    %146 = math.tanh %145 : vector<8x32xf32>
    %147 = arith.mulf %140, %146 : vector<8x32xf32>
    %c48 = arith.constant 48 : index
    %c0_30 = arith.constant 0 : index
    %148 = vector.load %arg10[%c48, %c0_30] : memref<64x32xf32, #tpu.memory_space<vmem>>, vector<8x32xf32>
    tpu.vector_store %arg10[%c48, %c0_30], %147 {strides = array<i32>} : memref<64x32xf32, #tpu.memory_space<vmem>>, vector<8x32xf32>,
    %149 = vector.extract_strided_slice %5 {offsets = [56, 0], sizes = [8, 128], strides = [1, 1]} : vector<64x128xf32> to vector<8x128xf32>
    %cst_31 = arith.constant dense<0.000000e+00> : vector<8x128xf32>
    %150 = tpu.matmul %147, %6, %cst_31 {dimension_numbers = #tpu.dot_dimension_numbers<[1], [0], [0], [1], [0, 0, 1, 1], [], []>} : vector<8x32xf32>, vector<32x128xf32>, vector<8x128xf32> -> vector<8x128xf32>
    %151 = arith.addf %149, %150 : vector<8x128xf32>
    %152 = vector.extract_strided_slice %151 {offsets = [0, 0], sizes = [8, 96], strides = [1, 1]} : vector<8x128xf32> to vector<8x96xf32>
    %153 = arith.negf %152 : vector<8x96xf32>
    %154 = math.exp %153 : vector<8x96xf32>
    %cst_32 = arith.constant 1.000000e+00 : f32
    %155 = vector.broadcast %cst_32 : f32 to vector<8x96xf32>
    %156 = arith.addf %155, %154 : vector<8x96xf32>
    %157 = arith.divf %155, %156 : vector<8x96xf32>
    %158 = vector.extract_strided_slice %157 {offsets = [0, 0], sizes = [8, 32], strides = [1, 1]} : vector<8x96xf32> to vector<8x32xf32>
    %159 = vector.extract_strided_slice %157 {offsets = [0, 32], sizes = [8, 32], strides = [1, 1]} : vector<8x96xf32> to vector<8x32xf32>
    %160 = vector.extract_strided_slice %157 {offsets = [0, 64], sizes = [8, 32], strides = [1, 1]} : vector<8x96xf32> to vector<8x32xf32>
    %161 = vector.extract_strided_slice %151 {offsets = [0, 96], sizes = [8, 32], strides = [1, 1]} : vector<8x128xf32> to vector<8x32xf32>
    %162 = math.tanh %161 : vector<8x32xf32>
    %163 = arith.mulf %159, %145 : vector<8x32xf32>
    %164 = arith.mulf %158, %162 : vector<8x32xf32>
    %165 = arith.addf %163, %164 : vector<8x32xf32>
    %166 = math.tanh %165 : vector<8x32xf32>
    %167 = arith.mulf %160, %166 : vector<8x32xf32>
    %c56 = arith.constant 56 : index
    %c0_33 = arith.constant 0 : index
    %168 = vector.load %arg10[%c56, %c0_33] : memref<64x32xf32, #tpu.memory_space<vmem>>, vector<8x32xf32>
    tpu.vector_store %arg10[%c56, %c0_33], %167 {strides = array<i32>} : memref<64x32xf32, #tpu.memory_space<vmem>>, vector<8x32xf32>,
    %c0_34 = arith.constant 0 : index
    %c0_35 = arith.constant 0 : index
    %169 = vector.load %arg10[%c0_34, %c0_35] : memref<64x32xf32, #tpu.memory_space<vmem>>, vector<64x32xf32>
    %c0_36 = arith.constant 0 : index
    %c0_37 = arith.constant 0 : index
    %170 = vector.load %arg5[%c0_36, %c0_37] : memref<32x16xf32, #tpu.memory_space<vmem>>, vector<32x16xf32>
    %cst_38 = arith.constant dense<0.000000e+00> : vector<64x16xf32>
    %171 = tpu.matmul %169, %170, %cst_38 {dimension_numbers = #tpu.dot_dimension_numbers<[1], [0], [0], [1], [0, 0, 1, 1], [], []>} : vector<64x32xf32>, vector<32x16xf32>, vector<64x16xf32> -> vector<64x16xf32>
    %c0_39 = arith.constant 0 : index
    %c0_40 = arith.constant 0 : index
    %172 = vector.load %arg6[%c0_39, %c0_40] : memref<1x16xf32, #tpu.memory_space<vmem>>, vector<1x16xf32>
    %173 = vector.broadcast %172 : vector<1x16xf32> to vector<64x16xf32>
    %174 = arith.addf %171, %173 : vector<64x16xf32>
    %c0_41 = arith.constant 0 : index
    %c0_42 = arith.constant 0 : index
    %175 = vector.load %arg7[%c0_41, %c0_42] : memref<1x16xf32, #tpu.memory_space<vmem>>, vector<1x16xf32>
    %176 = vector.broadcast %175 : vector<1x16xf32> to vector<64x16xf32>
    %177 = arith.mulf %174, %176 : vector<64x16xf32>
    %cst_43 = arith.constant dense<0.000000e+00> : vector<64xf32>
    %178 = vector.multi_reduction <add>, %177, %cst_43 [1] : vector<64x16xf32> to vector<64xf32>
    %179 = vector.shape_cast %178 : vector<64xf32> to vector<64x1xf32>
    %c0_44 = arith.constant 0 : index
    %c0_45 = arith.constant 0 : index
    %180 = vector.load %arg8[%c0_44, %c0_45] : memref<1x1xf32, #tpu.memory_space<vmem>>, vector<1x1xf32>
    %181 = vector.broadcast %180 : vector<1x1xf32> to vector<64x1xf32>
    %182 = arith.addf %179, %181 : vector<64x1xf32>
    %183 = arith.negf %182 : vector<64x1xf32>
    %184 = math.exp %183 : vector<64x1xf32>
    %cst_46 = arith.constant 1.000000e+00 : f32
    %185 = vector.broadcast %cst_46 : f32 to vector<64x1xf32>
    %186 = arith.addf %185, %184 : vector<64x1xf32>
    %187 = arith.divf %185, %186 : vector<64x1xf32>
    %c0_47 = arith.constant 0 : index
    %c0_48 = arith.constant 0 : index
    %188 = vector.load %arg9[%c0_47, %c0_48] : memref<64x1xf32, #tpu.memory_space<vmem>>, vector<64x1xf32>
    tpu.vector_store %arg9[%c0_47, %c0_48], %187 {strides = array<i32>} : memref<64x1xf32, #tpu.memory_space<vmem>>, vector<64x1xf32>,
    return
  }
  func.func @transform_0(%arg0: i32) -> (i32, i32) {
    %c0_i32 = arith.constant 0 : i32
    %c0_i32_0 = arith.constant 0 : i32
    %c0_i32_1 = arith.constant 0 : i32
    return %c0_i32, %c0_i32_0 : i32, i32
  }
  func.func @transform_1(%arg0: i32) -> (i32, i32) {
    %c0_i32 = arith.constant 0 : i32
    %c0_i32_0 = arith.constant 0 : i32
    %c0_i32_1 = arith.constant 0 : i32
    return %c0_i32, %c0_i32_0 : i32, i32
  }
  func.func @transform_2(%arg0: i32) -> (i32, i32) {
    %c0_i32 = arith.constant 0 : i32
    %c0_i32_0 = arith.constant 0 : i32
    %c0_i32_1 = arith.constant 0 : i32
    return %c0_i32, %c0_i32_0 : i32, i32
  }
  func.func @transform_3(%arg0: i32) -> (i32, i32) {
    %c0_i32 = arith.constant 0 : i32
    %c0_i32_0 = arith.constant 0 : i32
    %c0_i32_1 = arith.constant 0 : i32
    return %c0_i32, %c0_i32_0 : i32, i32
  }
  func.func @transform_4(%arg0: i32) -> (i32, i32) {
    %c0_i32 = arith.constant 0 : i32
    %c0_i32_0 = arith.constant 0 : i32
    %c0_i32_1 = arith.constant 0 : i32
    return %c0_i32, %c0_i32_0 : i32, i32
  }
  func.func @transform_5(%arg0: i32) -> (i32, i32) {
    %c0_i32 = arith.constant 0 : i32
    %c0_i32_0 = arith.constant 0 : i32
    %c0_i32_1 = arith.constant 0 : i32
    return %c0_i32, %c0_i32_0 : i32, i32
  }
  func.func @transform_6(%arg0: i32) -> (i32, i32) {
    %c0_i32 = arith.constant 0 : i32
    %c0_i32_0 = arith.constant 0 : i32
    %c0_i32_1 = arith.constant 0 : i32
    return %c0_i32, %c0_i32_0 : i32, i32
  }
  func.func @transform_7(%arg0: i32) -> (i32, i32) {
    %c0_i32 = arith.constant 0 : i32
    %c0_i32_0 = arith.constant 0 : i32
    %c0_i32_1 = arith.constant 0 : i32
    return %c0_i32, %c0_i32_0 : i32, i32
  }
  func.func @transform_8(%arg0: i32) -> (i32, i32) {
    %c0_i32 = arith.constant 0 : i32
    %c0_i32_0 = arith.constant 0 : i32
    %c0_i32_1 = arith.constant 0 : i32
    return %c0_i32, %c0_i32_0 : i32, i32
  }
}

</mosaic_0001>

<bundles_post_ra>
// kernel: base_rnn_forward.1
= control target key start
LH: loop header
LB: loop body
LE: loop exit
PB: predicated region body
PF: predicated region fallthrough
CT: control target
= control target key end

     0   :  { %vm48_vm0 = vcmask 130048   ;;  %v1596_v6 = vmov 0.0   ;;  %vm1597_vm1 = vmmov 0   ;;  %s1598_s29 = smov 32   ;;  %vm182_vm2 = vcmask 261120   ;;  %s1955_s1 = inlined_call_operand.vmem [shape: f32[16,128], index: 1, kind: input, shape index: {}]   ;;  %s1956_s0 = inlined_call_operand.vmem [shape: f32[64,16], index: 0, kind: input, shape index: {}]   ;;  %s1957_s2 = inlined_call_operand.vmem [shape: f32[32,128], index: 2, kind: input, shape index: {}]   ;;  %s1958_s3 = inlined_call_operand.vmem [shape: f32[1,128], index: 3, kind: input, shape index: {}]   ;;  %s1959_s4 = inlined_call_operand.vmem [shape: f32[32,16], index: 4, kind: input, shape index: {}]   ;;  %s1960_s5 = inlined_call_operand.vmem [shape: f32[1,16], index: 5, kind: input, shape index: {}]   ;;  %s1961_s6 = inlined_call_operand.vmem [shape: f32[1,16], index: 6, kind: input, shape index: {}]   ;;  %s1962_s7 = inlined_call_operand.<no memory space> [shape: f32[1,1], index: 7, kind: input, shape index: {}]   ;;  %s1963_s8 = inlined_call_operand.vmem [shape: f32[64,1], index: 8, kind: output, shape index: {}]  }
   0x1   :  { %v40_v0 = vld [vmem:[%s1955_s1 + $0x8] sm:$0xff]  ;;  %v39_v1 = vld [vmem:[%s1955_s1] sm:$0xff]  ;;  %v1661_v4 = vld [vmem:[%s1957_s2 + $0x18] sm:$0xff]  ;;  %vm1250_vm3 = vcmask 7168  }
   0x2   :  { %v35_v2 = vld [vmem:[%s1956_s0 + $0x20] sm:$0xff]  ;;  %1492 = vmatprep.subr.mxu1 %v40_v0  ;;  %1368 = vmatprep.subr.mxu0 %v40_v0  ;;  %v36_v3 = vld [vmem:[%s1956_s0 + $0x28] sm:$0xff]  ;;  %v37_v8 = vld [vmem:[%s1956_s0 + $0x30] sm:$0xff] }
   0x3   :  { %1494 = vmatpush3.msra.mxu1 %v40_v0  ;;  %1378 = vmatprep.mubr.msk.f32.mxu1 %vm48_vm0, %v35_v2  ;;  %v31_v5 = vld [vmem:[%s1956_s0] sm:$0xff]  ;;  %v32_v7 = vld [vmem:[%s1956_s0 + $0x8] sm:$0xff]  ;;  %v1678_v9 = vld [vmem:[%s1957_s2 + $0x10] sm:$0xff] }
   0x4   :  { %1493 = vmatprep.subr.mxu1 %v39_v1  ;;  %1369 = vmatpush3.msra.mxu0 %v40_v0  ;;  %v38_v10 = vld [vmem:[%s1956_s0 + $0x38] sm:$0xff]  ;;  %v1690_v11 = vld [vmem:[%s1957_s2 + $0x8] sm:$0xff]  ;;  %v1699_v12 = vld [vmem:[%s1957_s2] sm:$0xff] }
   0x5   :  { %1495 = vmatpush3.msra.mxu1 %v39_v1  ;;  %1370 = vmatprep.subr.mxu0 %v39_v1  ;;  %v1735_v18 = vld [vmem:[%s1958_s3] ss:$0 sm:$0xff]  ;;  %s1599_s3 = smov 64   ;;  %v33_v52 = vld [vmem:[%s1956_s0 + $0x10] sm:$0xff]  ;;  %v34_v53 = vld [vmem:[%s1956_s0 + $0x18] sm:$0xff] }
   0x6   :  { %1379 = vmatmul.mubr.msk.f32.vlgmr.msra.gmra.mxu1 %vm48_vm0, %v36_v3  ;;  %1384 = vmatprep.subr.mxu1 %v1596_v6 }
   0x7   :  { %1385 = vmatpush3.msra.mxu1 %v1661_v4  ;;  %1371 = vmatpush3.msra.mxu0 %v39_v1 }
   0x8   :  { %1372 = vmatprep.mubr.msk.f32.mxu0 %vm48_vm0, %v31_v5  ;;  %1386 = vmatprep.subr.mxu1 %v1596_v6 }
   0x9   :  { %1373 = vmatmul.mubr.msk.f32.vlgmr.msra.gmra.mxu0 %vm48_vm0, %v32_v7  ;;  %1381 = vmatprep.mubr.msk.f32.mxu1 %vm48_vm0, %v37_v8 }
   0xa   :  { %1387 = vmatpush3.msra.mxu1 %v1678_v9  ;;  %1406 = vmatprep.subr.mxu0 %v1596_v6 }
   0xb   :  { %1382 = vmatmul.mubr.msk.f32.gmra.mxu1 %vm48_vm0, %v38_v10  ;;  %1388 = vmatprep.subr.mxu1 %v1596_v6 }
   0xc   :  { %1389 = vmatpush3.msra.mxu1 %v1690_v11  ;;  %1392 = vmatprep.mubr.msk.f32.mxu1 %vm1597_vm1, %v1596_v6 }
   0xd   :  { %1390 = vmatprep.subr.mxu1 %v1596_v6  ;;  %1407 = vmatpush3.msra.mxu0 %v1661_v4 }
   0xe   :  { %1391 = vmatpush3.msra.mxu1 %v1699_v12  ;;  %1408 = vmatprep.subr.mxu0 %v1596_v6 }
   0xf   :  { %1393 = vmatmul.mubr.f32.vlgmr.msra.gmra.mxu1 %v1596_v6  ;;  %1395 = vmatprep.subr.mxu1 %v1596_v6 }
  0x10   :  { %1396 = vmatpush3.msra.mxu1 %v1661_v4  ;;  %1403 = vmatprep.mubr.msk.f32.mxu1 %vm1597_vm1, %v1596_v6 }
  0x11   :  { %1397 = vmatprep.subr.mxu1 %v1596_v6  ;;  %1409 = vmatpush3.msra.mxu0 %v1678_v9 }
  0x12   :  { %1398 = vmatpush3.msra.mxu1 %v1678_v9  ;;  %1410 = vmatprep.subr.mxu0 %v1596_v6 }
  0x13   :  { %1399 = vmatprep.subr.mxu1 %v1596_v6  ;;  %1411 = vmatpush3.msra.mxu0 %v1690_v11 }
  0x14   :  { %1400 = vmatpush3.msra.mxu1 %v1690_v11  ;;  %1412 = vmatprep.subr.mxu0 %v1596_v6 }
  0x15   :  { %1401 = vmatprep.subr.mxu1 %v1596_v6  ;;  %1413 = vmatpush3.msra.mxu0 %v1699_v12 }
  0x16   :  { %1402 = vmatpush3.msra.mxu1 %v1699_v12  ;;  %1428 = vmatprep.subr.mxu0 %v1596_v6 }
  0x17   :  { %1417 = vmatprep.subr.mxu1 %v1596_v6  ;;  %1375 = vmatprep.mubr.msk.f32.mxu0 %vm48_vm0, %v33_v52 }
  0x18   :  { %1376 = vmatmul.mubr.msk.f32.gmra.mxu0 %vm48_vm0, %v34_v53 }
  0x19   :  { %1414 = vmatprep.mubr.msk.f32.mxu0 %vm1597_vm1, %v1596_v6 }
  0xc6   :  { %v1726_v13 = vpop.f32.mrf.mxu1 }
  0xc8   :  { %v1728_v14 = vpop.f32.mrf.mxu1 }
  0xc9   :  { %v1374_v15 = vpop.f32.mrf.mxu0 }
  0xca   :  { %v145_v38 = vadd.f32 %v1374_v15, %v1735_v18 }
  0xcb   :  { %v1730_v16 = vpop.f32.mrf.mxu1  ;;  %v139_v17 = vpop.f32.mrf.mxu0 }
  0xcc   :  { %v140_v20 = vadd.f32 %v1735_v18, %v139_v17 }
  0xcd   :  { %v1737_v19 = vpop.f32.mrf.mxu1 }
  0xcf   :  { %v252_v21 = vpop.f32.mrf.mxu1 }
  0xd0   :  { %v256_v22 = vadd.f32 %v252_v21, %v140_v20 }
  0xd1   :  { %v1394_v23 = vpop.f32.mrf.mxu1 }
  0xd2   :  { %1500 = vtanh.f32 %v256_v22  ;;  %v1272_v25 = vmul.f32 -1.442695, %v256_v22 }
  0xd4   :  { %1502 = vpow2.f32 %v1272_v25 }
  0xd8   :  { %v1377_v58 = vpop.f32.mrf.mxu0 }
  0xda   :  { %v149_v59 = vpop.f32.mrf.mxu0 }
  0xdb   :  { %v150_v60 = vadd.f32 %v1735_v18, %v149_v59  ;;  %v165_v59 = vadd.f32 %v1726_v13, %v1735_v18 }
  0xdf   :  { %v1501_v24 = vpop.eup %1500 }
  0xe0   :  { %266 = vrot.lane.b32.xlu0 %v1501_v24, %s1598_s29  ;;  %v155_v24 = vadd.f32 %v1377_v58, %v1735_v18 }
  0xe1   :  { %v1503_v26 = vpop.eup %1502 }
  0xe2   :  { %v260_v27 = vadd.f32 1.0, %v1503_v26 }
  0xe4   :  { %1504 = vrcp.f32 %v260_v27 }
  0xf1   :  { %v1505_v28 = vpop.eup %1504 }
  0xf2   :  { %v264_v31 = vmul.f32 0.0, %v1505_v28 }
 0x152   :  { %v267_v29 = vpop.permute.xlu0 %266 }
 0x153   :  { %v269_v30 = vmul.f32 %v1505_v28, %v267_v29 }
 0x155   :  { %271 = vrot.lane.b32.xlu0 %v269_v30, %s1598_s29 }
 0x1c7   :  { %v272_v32 = vpop.permute.xlu0 %271 }
 0x1c8   :  { %v274_v33 = vadd.f32 %v272_v32, %v264_v31 }
 0x1ca   :  { %1506 = vtanh.f32 %v274_v33 }
 0x1d7   :  { %v1507_v34 = vpop.eup %1506 }
 0x1d8   :  { %277 = vrot.lane.b32.xlu1 %v1507_v34, %s1598_s29 }
 0x24a   :  { %v278_v35 = vpop.permute.xlu1 %277 }
 0x24b   :  { %v280_v36 = vmul.f32 %v1505_v28, %v278_v35 }
 0x24d   :  { %282 = vrot.lane.b32.xlu1 %v280_v36, %s1599_s3 }
 0x2bf   :  { %v283_v37 = vpop.permute.xlu1 %282 }
 0x2c0   :  { %285 = vst.msk [vmem:[#allocation2] sm:$0xff] %vm182_vm2, %v283_v37  ;;  %1404 = vmatmul.mubr.msk.f32.vlgmr.msra.gmra.mxu1 %vm182_vm2, %v283_v37 }
 0x2c1   :  { %1418 = vmatpush3.msra.mxu1 %v1661_v4  ;;  %1425 = vmatprep.mubr.msk.f32.mxu1 %vm1597_vm1, %v1596_v6 }
 0x2c2   :  { %1419 = vmatprep.subr.mxu1 %v1596_v6 }
 0x2c3   :  { %1420 = vmatpush3.msra.mxu1 %v1678_v9 }
 0x2c4   :  { %1421 = vmatprep.subr.mxu1 %v1596_v6 }
 0x2c5   :  { %1422 = vmatpush3.msra.mxu1 %v1690_v11 }
 0x2c6   :  { %1423 = vmatprep.subr.mxu1 %v1596_v6 }
 0x2c7   :  { %1424 = vmatpush3.msra.mxu1 %v1699_v12 }
 0x2c8   :  { %1439 = vmatprep.subr.mxu1 %v1596_v6 }
 0x380   :  { %v354_v39 = vpop.f32.mrf.mxu1 }
 0x381   :  { %v358_v40 = vadd.f32 %v354_v39, %v145_v38 }
 0x382   :  { %v1405_v41 = vpop.f32.mrf.mxu1 }
 0x383   :  { %1508 = vtanh.f32 %v358_v40  ;;  %v1274_v43 = vmul.f32 -1.442695, %v358_v40 }
 0x385   :  { %1510 = vpow2.f32 %v1274_v43 }
 0x390   :  { %v1509_v42 = vpop.eup %1508 }
 0x391   :  { %368 = vrot.lane.b32.xlu0 %v1509_v42, %s1598_s29  ;;  %v160_v42 = vadd.f32 %v1735_v18, %v1728_v14 }
 0x392   :  { %v1511_v44 = vpop.eup %1510 }
 0x393   :  { %v362_v45 = vadd.f32 1.0, %v1511_v44 }
 0x395   :  { %1512 = vrcp.f32 %v362_v45 }
 0x3a2   :  { %v1513_v46 = vpop.eup %1512 }
 0x3a3   :  { %v366_v49 = vmul.f32 %v1513_v46, %v274_v33 }
 0x403   :  { %v369_v47 = vpop.permute.xlu0 %368 }
 0x404   :  { %v371_v48 = vmul.f32 %v1513_v46, %v369_v47 }
 0x406   :  { %373 = vrot.lane.b32.xlu1 %v371_v48, %s1598_s29 }
 0x478   :  { %v374_v50 = vpop.permute.xlu1 %373 }
 0x479   :  { %v376_v51 = vadd.f32 %v374_v50, %v366_v49 }
 0x47b   :  { %1514 = vtanh.f32 %v376_v51 }
 0x488   :  { %v1515_v54 = vpop.eup %1514 }
 0x489   :  { %379 = vrot.lane.b32.xlu0 %v1515_v54, %s1598_s29 }
 0x4fb   :  { %v380_v55 = vpop.permute.xlu0 %379 }
 0x4fc   :  { %v382_v56 = vmul.f32 %v1513_v46, %v380_v55 }
 0x4fe   :  { %384 = vrot.lane.b32.xlu1 %v382_v56, %s1599_s3 }
 0x570   :  { %v385_v57 = vpop.permute.xlu1 %384 }
 0x571   :  { %387 = vst.msk [vmem:[#allocation2 + $0x8] sm:$0xff] %vm182_vm2, %v385_v57  ;;  %1415 = vmatmul.mubr.msk.f32.vlgmr.msra.gmra.mxu0 %vm182_vm2, %v385_v57 }
 0x572   :  { %1429 = vmatpush3.msra.mxu0 %v1661_v4  ;;  %1436 = vmatprep.mubr.msk.f32.mxu0 %vm1597_vm1, %v1596_v6 }
 0x573   :  { %1430 = vmatprep.subr.mxu0 %v1596_v6 }
 0x574   :  { %1431 = vmatpush3.msra.mxu0 %v1678_v9 }
 0x575   :  { %1432 = vmatprep.subr.mxu0 %v1596_v6 }
 0x576   :  { %1433 = vmatpush3.msra.mxu0 %v1690_v11 }
 0x577   :  { %1434 = vmatprep.subr.mxu0 %v1596_v6 }
 0x578   :  { %1435 = vmatpush3.msra.mxu0 %v1699_v12 }
 0x579   :  { %1450 = vmatprep.subr.mxu0 %v1596_v6 }
 0x631   :  { %v456_v61 = vpop.f32.mrf.mxu0 }
 0x632   :  { %v460_v62 = vadd.f32 %v456_v61, %v150_v60 }
 0x633   :  { %v1416_v63 = vpop.f32.mrf.mxu0 }
 0x634   :  { %1516 = vtanh.f32 %v460_v62  ;;  %v1276_v1 = vmul.f32 -1.442695, %v460_v62 }
 0x636   :  { %1518 = vpow2.f32 %v1276_v1 }
 0x641   :  { %v1517_v0 = vpop.eup %1516 }
 0x642   :  { %470 = vrot.lane.b32.xlu0 %v1517_v0, %s1598_s29 }
 0x643   :  { %v1519_v2 = vpop.eup %1518 }
 0x644   :  { %v464_v3 = vadd.f32 1.0, %v1519_v2 }
 0x646   :  { %1520 = vrcp.f32 %v464_v3  ;;  %v1011_v3 = vld [vmem:[%s1959_s4 + $0x18] sm:$0xff] }
 0x653   :  { %v1521_v5 = vpop.eup %1520 }
 0x654   :  { %v468_v10 = vmul.f32 %v1521_v5, %v376_v51 }
 0x6b4   :  { %v471_v7 = vpop.permute.xlu0 %470 }
 0x6b5   :  { %v473_v8 = vmul.f32 %v1521_v5, %v471_v7 }
 0x6b7   :  { %475 = vrot.lane.b32.xlu1 %v473_v8, %s1598_s29 }
 0x729   :  { %v476_v15 = vpop.permute.xlu1 %475 }
 0x72a   :  { %v478_v17 = vadd.f32 %v476_v15, %v468_v10  ;;  %v1010_v15 = vld [vmem:[%s1959_s4 + $0x10] sm:$0xff] }
 0x72c   :  { %1522 = vtanh.f32 %v478_v17 }
 0x739   :  { %v1523_v20 = vpop.eup %1522 }
 0x73a   :  { %481 = vrot.lane.b32.xlu0 %v1523_v20, %s1598_s29  ;;  %v1009_v20 = vld [vmem:[%s1959_s4 + $0x8] sm:$0xff] }
 0x7ac   :  { %v482_v21 = vpop.permute.xlu0 %481 }
 0x7ad   :  { %v484_v22 = vmul.f32 %v1521_v5, %v482_v21  ;;  %v1008_v21 = vld [vmem:[%s1959_s4] sm:$0xff] }
 0x7af   :  { %486 = vrot.lane.b32.xlu1 %v484_v22, %s1599_s3  ;;  %v1001_v22 = vld [vmem:[#allocation2 + $0x8] sm:$0xff] }
 0x821   :  { %v487_v23 = vpop.permute.xlu1 %486 }
 0x822   :  { %489 = vst.msk [vmem:[#allocation2 + $0x10] sm:$0xff] %vm182_vm2, %v487_v23  ;;  %1426 = vmatmul.mubr.msk.f32.vlgmr.msra.gmra.mxu1 %vm182_vm2, %v487_v23 }
 0x823   :  { %1440 = vmatpush3.msra.mxu1 %v1661_v4  ;;  %1447 = vmatprep.mubr.msk.f32.mxu1 %vm1597_vm1, %v1596_v6 }
 0x824   :  { %1441 = vmatprep.subr.mxu1 %v1596_v6 }
 0x825   :  { %1442 = vmatpush3.msra.mxu1 %v1678_v9 }
 0x826   :  { %1443 = vmatprep.subr.mxu1 %v1596_v6 }
 0x827   :  { %1444 = vmatpush3.msra.mxu1 %v1690_v11 }
 0x828   :  { %1445 = vmatprep.subr.mxu1 %v1596_v6 }
 0x829   :  { %1446 = vmatpush3.msra.mxu1 %v1699_v12  ;;  %v1002_v23 = vld [vmem:[#allocation2 + $0x10] sm:$0xff] }
 0x82a   :  { %1461 = vmatprep.subr.mxu1 %v1596_v6 }
 0x8e2   :  { %v558_v25 = vpop.f32.mrf.mxu1 }
 0x8e3   :  { %v562_v26 = vadd.f32 %v558_v25, %v155_v24 }
 0x8e4   :  { %v1427_v27 = vpop.f32.mrf.mxu1 }
 0x8e5   :  { %1524 = vtanh.f32 %v562_v26  ;;  %v1278_v29 = vmul.f32 -1.442695, %v562_v26  ;;  %v170_v27 = vadd.f32 %v1735_v18, %v1737_v19 }
 0x8e7   :  { %1526 = vpow2.f32 %v1278_v29 }
 0x8f2   :  { %v1525_v28 = vpop.eup %1524 }
 0x8f3   :  { %572 = vrot.lane.b32.xlu0 %v1525_v28, %s1598_s29 }
 0x8f4   :  { %v1527_v30 = vpop.eup %1526 }
 0x8f5   :  { %v566_v31 = vadd.f32 1.0, %v1527_v30 }
 0x8f7   :  { %1528 = vrcp.f32 %v566_v31 }
 0x904   :  { %v1529_v32 = vpop.eup %1528 }
 0x905   :  { %v570_v35 = vmul.f32 %v1529_v32, %v478_v17  ;;  %v1000_v17 = vld [vmem:[#allocation2] sm:$0xff] }
 0x965   :  { %v573_v33 = vpop.permute.xlu0 %572 }
 0x966   :  { %v575_v34 = vmul.f32 %v1529_v32, %v573_v33 }
 0x968   :  { %577 = vrot.lane.b32.xlu1 %v575_v34, %s1598_s29 }
 0x9da   :  { %v578_v36 = vpop.permute.xlu1 %577 }
 0x9db   :  { %v580_v37 = vadd.f32 %v578_v36, %v570_v35 }
 0x9dd   :  { %1530 = vtanh.f32 %v580_v37 }
 0x9ea   :  { %v1531_v38 = vpop.eup %1530 }
 0x9eb   :  { %583 = vrot.lane.b32.xlu0 %v1531_v38, %s1598_s29 }
 0xa5d   :  { %v584_v39 = vpop.permute.xlu0 %583 }
 0xa5e   :  { %v586_v40 = vmul.f32 %v1529_v32, %v584_v39 }
 0xa60   :  { %588 = vrot.lane.b32.xlu1 %v586_v40, %s1599_s3 }
 0xad2   :  { %v589_v41 = vpop.permute.xlu1 %588 }
 0xad3   :  { %591 = vst.msk [vmem:[#allocation2 + $0x18] sm:$0xff] %vm182_vm2, %v589_v41  ;;  %1437 = vmatmul.mubr.msk.f32.vlgmr.msra.gmra.mxu0 %vm182_vm2, %v589_v41 }
 0xad4   :  { %1451 = vmatpush3.msra.mxu0 %v1661_v4  ;;  %1458 = vmatprep.mubr.msk.f32.mxu0 %vm1597_vm1, %v1596_v6 }
 0xad5   :  { %1452 = vmatprep.subr.mxu0 %v1596_v6 }
 0xad6   :  { %1453 = vmatpush3.msra.mxu0 %v1678_v9 }
 0xad7   :  { %1454 = vmatprep.subr.mxu0 %v1596_v6 }
 0xad8   :  { %1455 = vmatpush3.msra.mxu0 %v1690_v11 }
 0xad9   :  { %1456 = vmatprep.subr.mxu0 %v1596_v6 }
 0xada   :  { %1457 = vmatpush3.msra.mxu0 %v1699_v12  ;;  %v1003_v24 = vld [vmem:[#allocation2 + $0x18] sm:$0xff] }
 0xadb   :  { %1472 = vmatprep.subr.mxu0 %v1011_v3 }
 0xb93   :  { %v660_v43 = vpop.f32.mrf.mxu0 }
 0xb94   :  { %v664_v44 = vadd.f32 %v660_v43, %v160_v42 }
 0xb95   :  { %v1438_v45 = vpop.f32.mrf.mxu0 }
 0xb96   :  { %1532 = vtanh.f32 %v664_v44  ;;  %v1280_v47 = vmul.f32 -1.442695, %v664_v44  ;;  %v175_v45 = vadd.f32 %v1730_v16, %v1735_v18 }
 0xb98   :  { %1534 = vpow2.f32 %v1280_v47 }
 0xba3   :  { %v1533_v46 = vpop.eup %1532 }
 0xba4   :  { %674 = vrot.lane.b32.xlu0 %v1533_v46, %s1598_s29 }
 0xba5   :  { %v1535_v48 = vpop.eup %1534 }
 0xba6   :  { %v668_v49 = vadd.f32 1.0, %v1535_v48 }
 0xba8   :  { %1536 = vrcp.f32 %v668_v49 }
 0xbb5   :  { %v1537_v50 = vpop.eup %1536 }
 0xbb6   :  { %v672_v53 = vmul.f32 %v1537_v50, %v580_v37 }
 0xc16   :  { %v675_v51 = vpop.permute.xlu0 %674 }
 0xc17   :  { %v677_v52 = vmul.f32 %v1537_v50, %v675_v51 }
 0xc19   :  { %679 = vrot.lane.b32.xlu1 %v677_v52, %s1598_s29 }
 0xc8b   :  { %v680_v54 = vpop.permute.xlu1 %679 }
 0xc8c   :  { %v682_v14 = vadd.f32 %v680_v54, %v672_v53 }
 0xc8e   :  { %1538 = vtanh.f32 %v682_v14 }
 0xc9b   :  { %v1539_v55 = vpop.eup %1538 }
 0xc9c   :  { %685 = vrot.lane.b32.xlu0 %v1539_v55, %s1598_s29 }
 0xd0e   :  { %v686_v56 = vpop.permute.xlu0 %685 }
 0xd0f   :  { %v688_v57 = vmul.f32 %v1537_v50, %v686_v56 }
 0xd11   :  { %690 = vrot.lane.b32.xlu1 %v688_v57, %s1599_s3 }
 0xd83   :  { %v691_v58 = vpop.permute.xlu1 %690 }
 0xd84   :  { %693 = vst.msk [vmem:[#allocation2 + $0x20] sm:$0xff] %vm182_vm2, %v691_v58  ;;  %1448 = vmatmul.mubr.msk.f32.vlgmr.msra.gmra.mxu1 %vm182_vm2, %v691_v58 }
 0xd85   :  { %1462 = vmatpush3.msra.mxu1 %v1661_v4  ;;  %1469 = vmatprep.mubr.msk.f32.mxu1 %vm1597_vm1, %v1596_v6 }
 0xd86   :  { %1463 = vmatprep.subr.mxu1 %v1596_v6 }
 0xd87   :  { %1464 = vmatpush3.msra.mxu1 %v1678_v9 }
 0xd88   :  { %1465 = vmatprep.subr.mxu1 %v1596_v6 }
 0xd89   :  { %1466 = vmatpush3.msra.mxu1 %v1690_v11 }
 0xd8a   :  { %1467 = vmatprep.subr.mxu1 %v1596_v6 }
 0xd8b   :  { %1468 = vmatpush3.msra.mxu1 %v1699_v12  ;;  %v1004_v25 = vld [vmem:[#allocation2 + $0x20] sm:$0xff] }
 0xe44   :  { %v762_v60 = vpop.f32.mrf.mxu1 }
 0xe45   :  { %v766_v4 = vadd.f32 %v762_v60, %v165_v59  ;;  %v1876_v60 = vld [vmem:[%s1960_s5] ss:$0 sm:$0xff] }
 0xe46   :  { %v1449_v61 = vpop.f32.mrf.mxu1 }
 0xe47   :  { %1540 = vtanh.f32 %v766_v4  ;;  %v1282_v63 = vmul.f32 -1.442695, %v766_v4 }
 0xe49   :  { %1542 = vpow2.f32 %v1282_v63 }
 0xe54   :  { %v1541_v62 = vpop.eup %1540 }
 0xe55   :  { %776 = vrot.lane.b32.xlu0 %v1541_v62, %s1598_s29  ;;  %v1882_v62 = vld [vmem:[%s1961_s6] ss:$0 sm:$0xff] }
 0xe56   :  { %v1543_v9 = vpop.eup %1542 }
 0xe57   :  { %v770_v0 = vadd.f32 1.0, %v1543_v9 }
 0xe59   :  { %1544 = vrcp.f32 %v770_v0 }
 0xe66   :  { %v1545_v11 = vpop.eup %1544 }
 0xe67   :  { %v774_v12 = vmul.f32 %v1545_v11, %v682_v14 }
 0xec7   :  { %v777_v1 = vpop.permute.xlu0 %776 }
 0xec8   :  { %v779_v6 = vmul.f32 %v1545_v11, %v777_v1 }
 0xeca   :  { %781 = vrot.lane.b32.xlu1 %v779_v6, %s1598_s29  ;;  %v13_v6 = vstv %s1962_s7 }
 0xecb   :  { %14 = vst [vmem:[#allocation3] sm:$0x1] %v13_v6 }
 0xf3c   :  { %v782_v2 = vpop.permute.xlu1 %781 }
 0xf3d   :  { %v784_v13 = vadd.f32 %v782_v2, %v774_v12 }
 0xf3f   :  { %1546 = vtanh.f32 %v784_v13 }
 0xf4c   :  { %v1547_v5 = vpop.eup %1546 }
 0xf4d   :  { %787 = vrot.lane.b32.xlu0 %v1547_v5, %s1598_s29 }
 0xfbf   :  { %v788_v7 = vpop.permute.xlu0 %787 }
 0xfc0   :  { %v790_v8 = vmul.f32 %v1545_v11, %v788_v7 }
 0xfc2   :  { %792 = vrot.lane.b32.xlu1 %v790_v8, %s1599_s3 }
0x1034   :  { %v793_v10 = vpop.permute.xlu1 %792 }
0x1035   :  { %795 = vst.msk [vmem:[#allocation2 + $0x28] sm:$0xff] %vm182_vm2, %v793_v10  ;;  %1459 = vmatmul.mubr.msk.f32.vlgmr.msra.gmra.mxu0 %vm182_vm2, %v793_v10 }
0x1036   :  { %1473 = vmatpush3.msra.mxu0 %v1011_v3  ;;  %1480 = vmatprep.mubr.msk.f32.mxu0 %vm182_vm2, %v1000_v17 }
0x1037   :  { %1474 = vmatprep.subr.mxu0 %v1010_v15 }
0x1038   :  { %1475 = vmatpush3.msra.mxu0 %v1010_v15 }
0x1039   :  { %1476 = vmatprep.subr.mxu0 %v1009_v20 }
0x103a   :  { %1477 = vmatpush3.msra.mxu0 %v1009_v20 }
0x103b   :  { %1478 = vmatprep.subr.mxu0 %v1008_v21 }
0x103c   :  { %1479 = vmatpush3.msra.mxu0 %v1008_v21  ;;  %v1005_v26 = vld [vmem:[#allocation2 + $0x28] sm:$0xff] }
0x103d   :  { %1481 = vmatmul.mubr.msk.f32.vlgmr.msra.gmra.mxu0 %vm182_vm2, %v1001_v22 }
0x103e   :  { %1483 = vmatprep.mubr.msk.f32.mxu0 %vm182_vm2, %v1002_v23 }
0x1041   :  { %1484 = vmatmul.mubr.msk.f32.gmra.mxu0 %vm182_vm2, %v1003_v24 }
0x1042   :  { %1486 = vmatprep.mubr.msk.f32.mxu0 %vm182_vm2, %v1004_v25 }
0x1045   :  { %1487 = vmatmul.mubr.msk.f32.gmra.mxu0 %vm182_vm2, %v1005_v26  ;;  %v1905_v26 = vld [vmem:[#allocation3] ss:$0 sm:$0xff] }
0x10f5   :  { %v864_v28 = vpop.f32.mrf.mxu0 }
0x10f6   :  { %v868_v29 = vadd.f32 %v864_v28, %v170_v27 }
0x10f7   :  { %v1460_v30 = vpop.f32.mrf.mxu0 }
0x10f8   :  { %1548 = vtanh.f32 %v868_v29  ;;  %v1284_v32 = vmul.f32 -1.442695, %v868_v29 }
0x10fa   :  { %1550 = vpow2.f32 %v1284_v32 }
0x10fd   :  { %v1482_v57 = vpop.f32.mrf.mxu0 }
0x10fe   :  { %v1115_v17 = vadd.f32 %v1482_v57, %v1876_v60 }
0x10ff   :  { %v1109_v58 = vpop.f32.mrf.mxu0 }
0x1100   :  { %v1110_v4 = vadd.f32 %v1876_v60, %v1109_v58  ;;  %v1156_v22 = vmul.f32 %v1882_v62, %v1115_v17 }
0x1101   :  { %v1485_v59 = vpop.f32.mrf.mxu0 }
0x1102   :  { %v1155_v9 = vmul.f32 %v1882_v62, %v1110_v4  ;;  %v1125_v0 = vadd.f32 %v1485_v59, %v1876_v60  ;;  %v1166_v23 = vsel %vm48_vm0, %v1156_v22, 0.0 }
0x1103   :  { %v1119_v61 = vpop.f32.mrf.mxu0 }
0x1104   :  { %v1120_v63 = vadd.f32 %v1876_v60, %v1119_v61  ;;  %v1163_v11 = vsel %vm48_vm0, %v1155_v9, 0.0  ;;  %v1158_v3 = vmul.f32 %v1882_v62, %v1125_v0 }
0x1105   :  { %v1549_v31 = vpop.eup %1548  ;;  %v1488_v12 = vpop.f32.mrf.mxu0 }
0x1106   :  { %878 = vrot.lane.b32.xlu0 %v1549_v31, %s1598_s29  ;;  %v1157_v1 = vmul.f32 %v1882_v62, %v1120_v63  ;;  %v1135_v2 = vadd.f32 %v1488_v12, %v1876_v60  ;;  %v1172_v5 = vsel %vm48_vm0, %v1158_v3, 0.0 }
0x1107   :  { %v1551_v33 = vpop.eup %1550  ;;  %v1129_v20 = vpop.f32.mrf.mxu0 }
0x1108   :  { %v872_v34 = vadd.f32 1.0, %v1551_v33  ;;  %v1160_v7 = vmul.f32 %v1882_v62, %v1135_v2  ;;  %v1130_v21 = vadd.f32 %v1876_v60, %v1129_v20 }
0x110a   :  { %1552 = vrcp.f32 %v872_v34  ;;  %v1178_v8 = vsel %vm48_vm0, %v1160_v7, 0.0  ;;  %v1159_v24 = vmul.f32 %v1882_v62, %v1130_v21 }
0x110c   :  { %v1175_v25 = vsel %vm48_vm0, %v1159_v24, 0.0 }
0x1117   :  { %v1553_v35 = vpop.eup %1552 }
0x1118   :  { %v876_v38 = vmul.f32 %v1553_v35, %v784_v13  ;;  %v1169_v13 = vsel %vm48_vm0, %v1157_v1, 0.0 }
0x1178   :  { %v879_v36 = vpop.permute.xlu0 %878 }
0x1179   :  { %v881_v37 = vmul.f32 %v1553_v35, %v879_v36 }
0x117b   :  { %883 = vrot.lane.b32.xlu1 %v881_v37, %s1598_s29 }
0x11ed   :  { %v884_v39 = vpop.permute.xlu1 %883 }
0x11ee   :  { %v886_v19 = vadd.f32 %v884_v39, %v876_v38 }
0x11f0   :  { %1554 = vtanh.f32 %v886_v19 }
0x11fd   :  { %v1555_v40 = vpop.eup %1554 }
0x11fe   :  { %889 = vrot.lane.b32.xlu0 %v1555_v40, %s1598_s29 }
0x1270   :  { %v890_v41 = vpop.permute.xlu0 %889 }
0x1271   :  { %v892_v42 = vmul.f32 %v1553_v35, %v890_v41 }
0x1273   :  { %894 = vrot.lane.b32.xlu1 %v892_v42, %s1599_s3 }
0x12e5   :  { %v895_v43 = vpop.permute.xlu1 %894 }
0x12e6   :  { %897 = vst.msk [vmem:[#allocation2 + $0x30] sm:$0xff] %vm182_vm2, %v895_v43  ;;  %1470 = vmatmul.mubr.msk.f32.vlgmr.msra.gmra.mxu1 %vm182_vm2, %v895_v43 }
0x12ed   :  { %v1006_v44 = vld [vmem:[#allocation2 + $0x30] sm:$0xff] }
0x12ee   :  { %1489 = vmatprep.mubr.msk.f32.mxu0 %vm182_vm2, %v1006_v44 }
0x13a6   :  { %v966_v46 = vpop.f32.mrf.mxu1 }
0x13a7   :  { %v970_v47 = vadd.f32 %v966_v46, %v175_v45 }
0x13a8   :  { %v1471_v48 = vpop.f32.mrf.mxu1 }
0x13a9   :  { %1556 = vtanh.f32 %v970_v47  ;;  %v1286_v50 = vmul.f32 -1.442695, %v970_v47 }
0x13ab   :  { %1558 = vpow2.f32 %v1286_v50 }
0x13b6   :  { %v1557_v49 = vpop.eup %1556 }
0x13b7   :  { %980 = vrot.lane.b32.xlu0 %v1557_v49, %s1598_s29 }
0x13b8   :  { %v1559_v51 = vpop.eup %1558 }
0x13b9   :  { %v974_v52 = vadd.f32 1.0, %v1559_v51 }
0x13bb   :  { %1560 = vrcp.f32 %v974_v52 }
0x13c8   :  { %v1561_v53 = vpop.eup %1560 }
0x13c9   :  { %v978_v55 = vmul.f32 %v1561_v53, %v886_v19 }
0x1429   :  { %v981_v54 = vpop.permute.xlu0 %980 }
0x142a   :  { %v983_v14 = vmul.f32 %v1561_v53, %v981_v54 }
0x142c   :  { %985 = vrot.lane.b32.xlu1 %v983_v14, %s1598_s29 }
0x149e   :  { %v986_v56 = vpop.permute.xlu1 %985 }
0x149f   :  { %v988_v16 = vadd.f32 %v986_v56, %v978_v55 }
0x14a1   :  { %1562 = vtanh.f32 %v988_v16 }
0x14ae   :  { %v1563_v18 = vpop.eup %1562 }
0x14af   :  { %991 = vrot.lane.b32.xlu0 %v1563_v18, %s1598_s29 }
0x14ce   :  { %1164 = vadd.xlane.f32.xlu0 %v1163_v11 }
0x14d2   :  { %1170 = vadd.xlane.f32.xlu0 %v1169_v13 }
0x14d6   :  { %1173 = vadd.xlane.f32.xlu0 %v1172_v5 }
0x14da   :  { %1179 = vadd.xlane.f32.xlu0 %v1178_v8 }
0x1521   :  { %v992_v10 = vpop.permute.xlu0 %991 }
0x1522   :  { %v994_v15 = vmul.f32 %v1561_v53, %v992_v10 }
0x1524   :  { %996 = vrot.lane.b32.xlu1 %v994_v15, %s1599_s3 }
0x1548   :  { %1167 = vadd.xlane.f32.xlu1 %v1166_v23 }
0x154c   :  { %1176 = vadd.xlane.f32.xlu1 %v1175_v25 }
0x1557   :  { %v1165_v27 = vpop.xlane.xlu0 %1164 }
0x1558   :  { %v1194_v28 = vadd.f32 %v1905_v26, %v1165_v27 }
0x155a   :  { %v1298_v29 = vmul.f32 -1.442695, %v1194_v28 }
0x155b   :  { %v1171_v30 = vpop.xlane.xlu0 %1170 }
0x155c   :  { %1564 = vpow2.f32 %v1298_v29  ;;  %v1196_v31 = vadd.f32 %v1905_v26, %v1171_v30 }
0x155e   :  { %v1300_v32 = vmul.f32 -1.442695, %v1196_v31 }
0x155f   :  { %v1174_v33 = vpop.xlane.xlu0 %1173 }
0x1560   :  { %1566 = vpow2.f32 %v1300_v32  ;;  %v1197_v34 = vadd.f32 %v1905_v26, %v1174_v33 }
0x1562   :  { %v1301_v35 = vmul.f32 -1.442695, %v1197_v34 }
0x1563   :  { %v1180_v36 = vpop.xlane.xlu0 %1179 }
0x1564   :  { %1568 = vpow2.f32 %v1301_v35  ;;  %v1199_v37 = vadd.f32 %v1905_v26, %v1180_v36 }
0x1566   :  { %v1303_v38 = vmul.f32 -1.442695, %v1199_v37 }
0x1568   :  { %1570 = vpow2.f32 %v1303_v38 }
0x1569   :  { %v1565_v39 = vpop.eup %1564 }
0x156a   :  { %v1226_v19 = vadd.f32 1.0, %v1565_v39 }
0x156c   :  { %1572 = vrcp.f32 %v1226_v19 }
0x156d   :  { %v1567_v40 = vpop.eup %1566 }
0x156e   :  { %v1228_v41 = vadd.f32 1.0, %v1567_v40 }
0x1570   :  { %1574 = vrcp.f32 %v1228_v41 }
0x1571   :  { %v1569_v42 = vpop.eup %1568 }
0x1572   :  { %v1229_v43 = vadd.f32 1.0, %v1569_v42 }
0x1574   :  { %1576 = vrcp.f32 %v1229_v43 }
0x1575   :  { %v1571_v44 = vpop.eup %1570 }
0x1576   :  { %v1231_v45 = vadd.f32 1.0, %v1571_v44 }
0x1578   :  { %1578 = vrcp.f32 %v1231_v45 }
0x1579   :  { %v1573_v46 = vpop.eup %1572 }
0x157a   :  { %1251 = vst.msk [vmem:[%s1963_s8] sm:$0xff] %vm1250_vm3, %v1573_v46 }
0x157d   :  { %v1575_v47 = vpop.eup %1574 }
0x157e   :  { %1253 = vst.msk [vmem:[%s1963_s8 + $0x10] sm:$0xff] %vm1250_vm3, %v1575_v47 }
0x1581   :  { %v1577_v48 = vpop.eup %1576 }
0x1582   :  { %1254 = vst.msk [vmem:[%s1963_s8 + $0x18] sm:$0xff] %vm1250_vm3, %v1577_v48 }
0x1585   :  { %v1579_v49 = vpop.eup %1578 }
0x1586   :  { %1256 = vst.msk [vmem:[%s1963_s8 + $0x28] sm:$0xff] %vm1250_vm3, %v1579_v49 }
0x1596   :  { %v997_v50 = vpop.permute.xlu1 %996 }
0x1597   :  { %999 = vst.msk [vmem:[#allocation2 + $0x38] sm:$0xff] %vm182_vm2, %v997_v50 }
0x159e   :  { %v1007_v51 = vld [vmem:[#allocation2 + $0x38] sm:$0xff] }
0x159f   :  { %1490 = vmatmul.mubr.msk.f32.gmra.mxu0 %vm182_vm2, %v1007_v51 }
0x15d1   :  { %v1168_v52 = vpop.xlane.xlu1 %1167 }
0x15d2   :  { %v1195_v53 = vadd.f32 %v1905_v26, %v1168_v52 }
0x15d4   :  { %v1299_v54 = vmul.f32 -1.442695, %v1195_v53 }
0x15d5   :  { %v1177_v14 = vpop.xlane.xlu1 %1176 }
0x15d6   :  { %1580 = vpow2.f32 %v1299_v54  ;;  %v1198_v55 = vadd.f32 %v1905_v26, %v1177_v14 }
0x15d8   :  { %v1302_v56 = vmul.f32 -1.442695, %v1198_v55 }
0x15da   :  { %1582 = vpow2.f32 %v1302_v56 }
0x15e3   :  { %v1581_v16 = vpop.eup %1580 }
0x15e4   :  { %v1227_v18 = vadd.f32 1.0, %v1581_v16 }
0x15e6   :  { %1584 = vrcp.f32 %v1227_v18 }
0x15e7   :  { %v1583_v57 = vpop.eup %1582 }
0x15e8   :  { %v1230_v58 = vadd.f32 1.0, %v1583_v57 }
0x15ea   :  { %1586 = vrcp.f32 %v1230_v58 }
0x15f3   :  { %v1585_v59 = vpop.eup %1584 }
0x15f4   :  { %1252 = vst.msk [vmem:[%s1963_s8 + $0x8] sm:$0xff] %vm1250_vm3, %v1585_v59 }
0x15f7   :  { %v1587_v4 = vpop.eup %1586 }
0x15f8   :  { %1255 = vst.msk [vmem:[%s1963_s8 + $0x20] sm:$0xff] %vm1250_vm3, %v1587_v4 }
0x165f   :  { %v1491_v61 = vpop.f32.mrf.mxu0 }
0x1660   :  { %v1145_v63 = vadd.f32 %v1491_v61, %v1876_v60 }
0x1661   :  { %v1139_v9 = vpop.f32.mrf.mxu0 }
0x1662   :  { %v1140_v0 = vadd.f32 %v1876_v60, %v1139_v9  ;;  %v1162_v11 = vmul.f32 %v1882_v62, %v1145_v63 }
0x1664   :  { %v1184_v1 = vsel %vm48_vm0, %v1162_v11, 0.0  ;;  %v1161_v6 = vmul.f32 %v1882_v62, %v1140_v0 }
0x1665   :  { %1185 = vadd.xlane.f32.xlu0 %v1184_v1 }
0x1666   :  { %v1181_v12 = vsel %vm48_vm0, %v1161_v6, 0.0 }
0x1667   :  { %1182 = vadd.xlane.f32.xlu1 %v1181_v12 }
0x16ee   :  { %v1186_v2 = vpop.xlane.xlu0 %1185 }
0x16ef   :  { %v1201_v13 = vadd.f32 %v1905_v26, %v1186_v2 }
0x16f0   :  { %v1183_v3 = vpop.xlane.xlu1 %1182 }
0x16f1   :  { %v1305_v5 = vmul.f32 -1.442695, %v1201_v13  ;;  %v1200_v7 = vadd.f32 %v1905_v26, %v1183_v3 }
0x16f3   :  { %1588 = vpow2.f32 %v1305_v5  ;;  %v1304_v8 = vmul.f32 -1.442695, %v1200_v7 }
0x16f5   :  { %1590 = vpow2.f32 %v1304_v8 }
0x1700   :  { %v1589_v60 = vpop.eup %1588 }
0x1701   :  { %v1233_v10 = vadd.f32 1.0, %v1589_v60 }
0x1702   :  { %v1591_v15 = vpop.eup %1590 }
0x1703   :  { %1592 = vrcp.f32 %v1233_v10  ;;  %v1232_v17 = vadd.f32 1.0, %v1591_v15 }
0x1705   :  { %1594 = vrcp.f32 %v1232_v17 }
0x1710   :  { %v1593_v62 = vpop.eup %1592 }
0x1711   :  { %1258 = vst.msk [vmem:[%s1963_s8 + $0x38] sm:$0xff] %vm1250_vm3, %v1593_v62 }
0x1712   :  { %v1595_v20 = vpop.eup %1594 }
0x1713   :  { %1257 = vst.msk [vmem:[%s1963_s8 + $0x30] sm:$0xff] %vm1250_vm3, %v1595_v20 }

</bundles_post_ra>
